<compile_context>
chip_gen: v7x
topology: tpu7x:2x2x1
jax: 0.10.0
libtpu: 0.0.40
codegen_flags: <defaults>
</compile_context>

<pallas_src>
import functools

import jax
import jax.numpy as jnp
from jax.experimental import pallas as pl
from jax.experimental.pallas import tpu as pltpu

HIDDEN = 128
LANE = 128


def _round_up(n, m):
    return ((n + m - 1) // m) * m


def actor_kernel(x_ref, w1_ref, b1_ref, w2_ref, b2_ref, w3_ref, b3_ref,
                 wa_ref, ba_ref, out_ref, *, max_action):
    """One batch tile of the 4-layer actor MLP (bf16 MXU, f32 accumulate/epilogue)."""
    x = x_ref[...].astype(jnp.bfloat16)
    h = jnp.dot(x, w1_ref[...], preferred_element_type=jnp.float32) + b1_ref[...]
    h = jnp.maximum(h, 0.0)
    h = jnp.dot(h.astype(jnp.bfloat16), w2_ref[...],
                preferred_element_type=jnp.float32) + b2_ref[...]
    h = jnp.maximum(h, 0.0)
    h = jnp.dot(h.astype(jnp.bfloat16), w3_ref[...],
                preferred_element_type=jnp.float32) + b3_ref[...]
    h = jnp.maximum(h, 0.0)
    a = jnp.dot(h.astype(jnp.bfloat16), wa_ref[...],
                preferred_element_type=jnp.float32) + ba_ref[...]
    out_ref[...] = max_action * jnp.tanh(a)   # full 128-lane store (lane-dense)


def actor_forward(x, params, max_action, *, block_m=512):
    """Pallas-backed forward. x: (batch, obs+goal) -> (batch, action)."""
    batch, in_dim = x.shape
    action_dim = params["wa"].shape[1]

    # --- Lane-dense action head: pad the (tiny) head weights to 128 columns. ---
    n_pad = max(LANE, _round_up(action_dim, LANE))
    wa, ba = params["wa"], params["ba"]
    if action_dim != n_pad:
        wa = jnp.pad(wa, ((0, 0), (0, n_pad - action_dim)))
        ba = jnp.pad(ba, ((0, 0), (0, n_pad - action_dim)))

    # --- Batch tile: large (amortize per-step overhead), but split so there are
    #     >= 2 grid steps when the batch permits (both v7x TensorCores busy). ---
    half = pl.cdiv(batch, 2)
    if half >= 128:
        tm = _round_up(half, 128)          # MXU-friendly M dimension
    else:
        tm = _round_up(max(half, 1), 8)    # f32 sublane multiple
    tm = min(block_m, tm)
    grid = (pl.cdiv(batch, tm),)           # ragged last block handled by Pallas

    # TODO(synk): if the upstream producer can emit x in bf16, feed it directly
    # (the kernel's .astype is then a no-op) to halve the dominant HBM read.

    def resident(shape):
        # Whole (small) weight/bias stays VMEM-resident across all grid steps.
        return pl.BlockSpec(shape, lambda i: (0, 0))

    flops = 2 * batch * (in_dim * HIDDEN + 2 * HIDDEN * HIDDEN + HIDDEN * n_pad)
    transcendentals = batch * n_pad
    weight_bytes = sum(int(a.size) * a.dtype.itemsize for a in
                       (params["w1"], params["b1"], params["w2"], params["b2"],
                        params["w3"], params["b3"], wa, ba))
    bytes_accessed = (int(x.size) * x.dtype.itemsize
                      + batch * n_pad * 4
                      + weight_bytes)

    out = pl.pallas_call(
        functools.partial(actor_kernel, max_action=float(max_action)),
        out_shape=jax.ShapeDtypeStruct((batch, n_pad), jnp.float32),
        grid=grid,
        in_specs=[
            pl.BlockSpec((tm, in_dim), lambda i: (i, 0)),        # activations: tiled over batch
            resident((in_dim, HIDDEN)), resident((1, HIDDEN)),   # fc1
            resident((HIDDEN, HIDDEN)), resident((1, HIDDEN)),   # fc2
            resident((HIDDEN, HIDDEN)), resident((1, HIDDEN)),   # fc3
            resident((HIDDEN, n_pad)), resident((1, n_pad)),     # action_out (lane-padded)
        ],
        out_specs=pl.BlockSpec((tm, n_pad), lambda i: (i, 0)),
        compiler_params=pltpu.CompilerParams(
            dimension_semantics=("parallel",),   # shard batch grid across TCs (v7x)
            vmem_limit_bytes=32 * 1024 * 1024,
        ),
        cost_estimate=pl.CostEstimate(
            flops=int(flops),
            transcendentals=int(transcendentals),
            bytes_accessed=int(bytes_accessed),
        ),
    )(
        x,
        params["w1"], params["b1"],
        params["w2"], params["b2"],
        params["w3"], params["b3"],
        wa, ba,
    )
    return out[:, :action_dim]


def init_params(key, in_dim, action_dim, hidden=HIDDEN):
    """Deterministic synthetic init. Weights (in, out) in bf16, biases f32."""
    ks = jax.random.split(key, 8)
    scale = 0.05

    def f(k, shape):
        return scale * jax.random.normal(k, shape, jnp.float32)

    return {
        "w1": f(ks[0], (in_dim, hidden)).astype(jnp.bfloat16),
        "b1": f(ks[1], (1, hidden)),
        "w2": f(ks[2], (hidden, hidden)).astype(jnp.bfloat16),
        "b2": f(ks[3], (1, hidden)),
        "w3": f(ks[4], (hidden, hidden)).astype(jnp.bfloat16),
        "b3": f(ks[5], (1, hidden)),
        "wa": f(ks[6], (hidden, action_dim)).astype(jnp.bfloat16),
        "ba": f(ks[7], (1, action_dim)),
    }


def ref_forward(x, params, max_action):
    """Plain-JAX reference with the same bf16-weight / f32-accumulate recipe."""
    h = x.astype(jnp.bfloat16)
    h = jnp.maximum(jnp.dot(h, params["w1"],
                            preferred_element_type=jnp.float32) + params["b1"], 0.0)
    h = jnp.maximum(jnp.dot(h.astype(jnp.bfloat16), params["w2"],
                            preferred_element_type=jnp.float32) + params["b2"], 0.0)
    h = jnp.maximum(jnp.dot(h.astype(jnp.bfloat16), params["w3"],
                            preferred_element_type=jnp.float32) + params["b3"], 0.0)
    a = jnp.dot(h.astype(jnp.bfloat16), params["wa"],
                preferred_element_type=jnp.float32) + params["ba"]
    return max_action * jnp.tanh(a)


if __name__ == "__main__":
    # env_params consistent with the actor module: input = obs + goal, output = action
    env_params = {"obs": 10, "goal": 3, "action": 4, "action_max": 1.0}
    in_dim = env_params["obs"] + env_params["goal"]

    key = jax.random.PRNGKey(0)
    k_x, k_p, k_x2 = jax.random.split(key, 3)
    params = init_params(k_p, in_dim, env_params["action"])

    # Primary small-shape check (batch=2).
    x = jax.random.normal(k_x, (2, in_dim), jnp.float32)
    actions = jax.block_until_ready(actor_forward(x, params, env_params["action_max"]))
    a_ref = ref_forward(x, params, env_params["action_max"])
    assert actions.shape == (2, env_params["action"])
    assert jnp.allclose(actions, a_ref, atol=1e-3, rtol=1e-3), (actions, a_ref)
    assert jnp.all(jnp.abs(actions) <= env_params["action_max"] + 1e-6)

    # Secondary check: multi-step grid with a ragged last block (batch=200).
    x2 = jax.random.normal(k_x2, (200, in_dim), jnp.float32)
    actions2 = jax.block_until_ready(actor_forward(x2, params, env_params["action_max"]))
    a_ref2 = ref_forward(x2, params, env_params["action_max"])
    assert actions2.shape == (200, env_params["action"])
    assert jnp.allclose(actions2, a_ref2, atol=1e-3, rtol=1e-3)
    assert jnp.all(jnp.abs(actions2) <= env_params["action_max"] + 1e-6)

    print("KERNEL_OK")
</pallas_src>

<mosaic_0001>
module attributes {stable_mosaic.version = 11 : i64} {
  func.func @actor_kernel(%arg0: i32, %arg1: memref<8x13xf32, #tpu.memory_space<vmem>>, %arg2: memref<13x128xbf16, #tpu.memory_space<vmem>>, %arg3: memref<1x128xf32, #tpu.memory_space<vmem>>, %arg4: memref<128x128xbf16, #tpu.memory_space<vmem>>, %arg5: memref<1x128xf32, #tpu.memory_space<vmem>>, %arg6: memref<128x128xbf16, #tpu.memory_space<vmem>>, %arg7: memref<1x128xf32, #tpu.memory_space<vmem>>, %arg8: memref<128x128xbf16, #tpu.memory_space<vmem>>, %arg9: memref<1x128xf32, #tpu.memory_space<vmem>>, %arg10: memref<8x128xf32, #tpu.memory_space<vmem>>) attributes {dimension_semantics = [#tpu.dimension_semantics<parallel>], iteration_bounds = array<i64: 1>, scalar_prefetch = 0 : i64, scratch_operands = 0 : i64, tpu.core_type = #tpu.core_type<tc>, window_params = [{transform_indices = @transform_0, window_bounds = array<i64: 8, 13>}, {pipeline_mode = #tpu.pipeline_mode<synchronous>, transform_indices = @transform_1, window_bounds = array<i64: 13, 128>}, {pipeline_mode = #tpu.pipeline_mode<synchronous>, transform_indices = @transform_2, window_bounds = array<i64: 1, 128>}, {pipeline_mode = #tpu.pipeline_mode<synchronous>, transform_indices = @transform_3, window_bounds = array<i64: 128, 128>}, {pipeline_mode = #tpu.pipeline_mode<synchronous>, transform_indices = @transform_4, window_bounds = array<i64: 1, 128>}, {pipeline_mode = #tpu.pipeline_mode<synchronous>, transform_indices = @transform_5, window_bounds = array<i64: 128, 128>}, {pipeline_mode = #tpu.pipeline_mode<synchronous>, transform_indices = @transform_6, window_bounds = array<i64: 1, 128>}, {pipeline_mode = #tpu.pipeline_mode<synchronous>, transform_indices = @transform_7, window_bounds = array<i64: 128, 128>}, {pipeline_mode = #tpu.pipeline_mode<synchronous>, transform_indices = @transform_8, window_bounds = array<i64: 1, 128>}, {transform_indices = @transform_9, window_bounds = array<i64: 8, 128>}]} {
    %c0 = arith.constant 0 : index
    %c0_0 = arith.constant 0 : index
    %0 = vector.load %arg1[%c0, %c0_0] : memref<8x13xf32, #tpu.memory_space<vmem>>, vector<8x13xf32>
    %1 = arith.truncf %0 : vector<8x13xf32> to vector<8x13xbf16>
    %c0_1 = arith.constant 0 : index
    %c0_2 = arith.constant 0 : index
    %2 = vector.load %arg2[%c0_1, %c0_2] : memref<13x128xbf16, #tpu.memory_space<vmem>>, vector<13x128xbf16>
    %cst = arith.constant dense<0.000000e+00> : vector<8x128xf32>
    %3 = tpu.matmul %1, %2, %cst {dimension_numbers = #tpu.dot_dimension_numbers<[1], [0], [0], [1], [0, 0, 1, 1], [], []>} : vector<8x13xbf16>, vector<13x128xbf16>, vector<8x128xf32> -> vector<8x128xf32>
    %c0_3 = arith.constant 0 : index
    %c0_4 = arith.constant 0 : index
    %4 = vector.load %arg3[%c0_3, %c0_4] : memref<1x128xf32, #tpu.memory_space<vmem>>, vector<1x128xf32>
    %5 = vector.broadcast %4 : vector<1x128xf32> to vector<8x128xf32>
    %6 = arith.addf %3, %5 : vector<8x128xf32>
    %cst_5 = arith.constant 0.000000e+00 : f32
    %7 = vector.broadcast %cst_5 : f32 to vector<8x128xf32>
    %8 = arith.maximumf %6, %7 : vector<8x128xf32>
    %9 = arith.truncf %8 : vector<8x128xf32> to vector<8x128xbf16>
    %c0_6 = arith.constant 0 : index
    %c0_7 = arith.constant 0 : index
    %10 = vector.load %arg4[%c0_6, %c0_7] : memref<128x128xbf16, #tpu.memory_space<vmem>>, vector<128x128xbf16>
    %cst_8 = arith.constant dense<0.000000e+00> : vector<8x128xf32>
    %11 = tpu.matmul %9, %10, %cst_8 {dimension_numbers = #tpu.dot_dimension_numbers<[1], [0], [0], [1], [0, 0, 1, 1], [], []>} : vector<8x128xbf16>, vector<128x128xbf16>, vector<8x128xf32> -> vector<8x128xf32>
    %c0_9 = arith.constant 0 : index
    %c0_10 = arith.constant 0 : index
    %12 = vector.load %arg5[%c0_9, %c0_10] : memref<1x128xf32, #tpu.memory_space<vmem>>, vector<1x128xf32>
    %13 = vector.broadcast %12 : vector<1x128xf32> to vector<8x128xf32>
    %14 = arith.addf %11, %13 : vector<8x128xf32>
    %cst_11 = arith.constant 0.000000e+00 : f32
    %15 = vector.broadcast %cst_11 : f32 to vector<8x128xf32>
    %16 = arith.maximumf %14, %15 : vector<8x128xf32>
    %17 = arith.truncf %16 : vector<8x128xf32> to vector<8x128xbf16>
    %c0_12 = arith.constant 0 : index
    %c0_13 = arith.constant 0 : index
    %18 = vector.load %arg6[%c0_12, %c0_13] : memref<128x128xbf16, #tpu.memory_space<vmem>>, vector<128x128xbf16>
    %cst_14 = arith.constant dense<0.000000e+00> : vector<8x128xf32>
    %19 = tpu.matmul %17, %18, %cst_14 {dimension_numbers = #tpu.dot_dimension_numbers<[1], [0], [0], [1], [0, 0, 1, 1], [], []>} : vector<8x128xbf16>, vector<128x128xbf16>, vector<8x128xf32> -> vector<8x128xf32>
    %c0_15 = arith.constant 0 : index
    %c0_16 = arith.constant 0 : index
    %20 = vector.load %arg7[%c0_15, %c0_16] : memref<1x128xf32, #tpu.memory_space<vmem>>, vector<1x128xf32>
    %21 = vector.broadcast %20 : vector<1x128xf32> to vector<8x128xf32>
    %22 = arith.addf %19, %21 : vector<8x128xf32>
    %cst_17 = arith.constant 0.000000e+00 : f32
    %23 = vector.broadcast %cst_17 : f32 to vector<8x128xf32>
    %24 = arith.maximumf %22, %23 : vector<8x128xf32>
    %25 = arith.truncf %24 : vector<8x128xf32> to vector<8x128xbf16>
    %c0_18 = arith.constant 0 : index
    %c0_19 = arith.constant 0 : index
    %26 = vector.load %arg8[%c0_18, %c0_19] : memref<128x128xbf16, #tpu.memory_space<vmem>>, vector<128x128xbf16>
    %cst_20 = arith.constant dense<0.000000e+00> : vector<8x128xf32>
    %27 = tpu.matmul %25, %26, %cst_20 {dimension_numbers = #tpu.dot_dimension_numbers<[1], [0], [0], [1], [0, 0, 1, 1], [], []>} : vector<8x128xbf16>, vector<128x128xbf16>, vector<8x128xf32> -> vector<8x128xf32>
    %c0_21 = arith.constant 0 : index
    %c0_22 = arith.constant 0 : index
    %28 = vector.load %arg9[%c0_21, %c0_22] : memref<1x128xf32, #tpu.memory_space<vmem>>, vector<1x128xf32>
    %29 = vector.broadcast %28 : vector<1x128xf32> to vector<8x128xf32>
    %30 = arith.addf %27, %29 : vector<8x128xf32>
    %31 = math.tanh %30 : vector<8x128xf32>
    %cst_23 = arith.constant 1.000000e+00 : f32
    %32 = vector.broadcast %cst_23 : f32 to vector<8x128xf32>
    %33 = arith.mulf %32, %31 : vector<8x128xf32>
    %c0_24 = arith.constant 0 : index
    %c0_25 = arith.constant 0 : index
    %34 = vector.load %arg10[%c0_24, %c0_25] : memref<8x128xf32, #tpu.memory_space<vmem>>, vector<8x128xf32>
    tpu.vector_store %arg10[%c0_24, %c0_25], %33 {strides = array<i32>} : memref<8x128xf32, #tpu.memory_space<vmem>>, vector<8x128xf32>,
    return
  }
  func.func @transform_0(%arg0: i32) -> (i32, i32) {
    %c0_i32 = arith.constant 0 : i32
    %c0_i32_0 = arith.constant 0 : i32
    return %arg0, %c0_i32 : i32, i32
  }
  func.func @transform_1(%arg0: i32) -> (i32, i32) {
    %c0_i32 = arith.constant 0 : i32
    %c0_i32_0 = arith.constant 0 : i32
    %c0_i32_1 = arith.constant 0 : i32
    return %c0_i32, %c0_i32_0 : i32, i32
  }
  func.func @transform_2(%arg0: i32) -> (i32, i32) {
    %c0_i32 = arith.constant 0 : i32
    %c0_i32_0 = arith.constant 0 : i32
    %c0_i32_1 = arith.constant 0 : i32
    return %c0_i32, %c0_i32_0 : i32, i32
  }
  func.func @transform_3(%arg0: i32) -> (i32, i32) {
    %c0_i32 = arith.constant 0 : i32
    %c0_i32_0 = arith.constant 0 : i32
    %c0_i32_1 = arith.constant 0 : i32
    return %c0_i32, %c0_i32_0 : i32, i32
  }
  func.func @transform_4(%arg0: i32) -> (i32, i32) {
    %c0_i32 = arith.constant 0 : i32
    %c0_i32_0 = arith.constant 0 : i32
    %c0_i32_1 = arith.constant 0 : i32
    return %c0_i32, %c0_i32_0 : i32, i32
  }
  func.func @transform_5(%arg0: i32) -> (i32, i32) {
    %c0_i32 = arith.constant 0 : i32
    %c0_i32_0 = arith.constant 0 : i32
    %c0_i32_1 = arith.constant 0 : i32
    return %c0_i32, %c0_i32_0 : i32, i32
  }
  func.func @transform_6(%arg0: i32) -> (i32, i32) {
    %c0_i32 = arith.constant 0 : i32
    %c0_i32_0 = arith.constant 0 : i32
    %c0_i32_1 = arith.constant 0 : i32
    return %c0_i32, %c0_i32_0 : i32, i32
  }
  func.func @transform_7(%arg0: i32) -> (i32, i32) {
    %c0_i32 = arith.constant 0 : i32
    %c0_i32_0 = arith.constant 0 : i32
    %c0_i32_1 = arith.constant 0 : i32
    return %c0_i32, %c0_i32_0 : i32, i32
  }
  func.func @transform_8(%arg0: i32) -> (i32, i32) {
    %c0_i32 = arith.constant 0 : i32
    %c0_i32_0 = arith.constant 0 : i32
    %c0_i32_1 = arith.constant 0 : i32
    return %c0_i32, %c0_i32_0 : i32, i32
  }
  func.func @transform_9(%arg0: i32) -> (i32, i32) {
    %c0_i32 = arith.constant 0 : i32
    %c0_i32_0 = arith.constant 0 : i32
    return %arg0, %c0_i32 : i32, i32
  }
}

</mosaic_0001>

<bundles_post_ra>
// kernel: tpu_custom_call.1
= control target key start
LH: loop header
LB: loop body
LE: loop exit
PB: predicated region body
PF: predicated region fallthrough
CT: control target
= control target key end

     0   :  { %14 = vsyncpa [#allocation3], 0  ;;  %s1032_s0 = inlined_call_operand.hbm [shape: f32[2,13], index: 0, kind: input, shape index: {}]   ;;  %s1033_s1 = inlined_call_operand.hbm [shape: bf16[13,128], index: 1, kind: input, shape index: {}]   ;;  %s1034_s2 = inlined_call_operand.vmem [shape: f32[1,128], index: 2, kind: input, shape index: {}]   ;;  %s1035_s3 = inlined_call_operand.hbm [shape: bf16[128,128], index: 3, kind: input, shape index: {}]   ;;  %s1036_s4 = inlined_call_operand.vmem [shape: f32[1,128], index: 4, kind: input, shape index: {}]   ;;  %s1037_s5 = inlined_call_operand.hbm [shape: bf16[128,128], index: 5, kind: input, shape index: {}]   ;;  %s1038_s6 = inlined_call_operand.vmem [shape: f32[1,128], index: 6, kind: input, shape index: {}]   ;;  %s1039_s7 = inlined_call_operand.hbm [shape: bf16[128,128], index: 7, kind: input, shape index: {}]   ;;  %s1040_s8 = inlined_call_operand.vmem [shape: f32[1,128], index: 8, kind: input, shape index: {}]   ;;  %s1041_s9 = inlined_call_operand.hbm [shape: f32[2,128], index: 9, kind: output, shape index: {}]  }
   0x1   :  { %15 = vsyncpa [#allocation6], 0 }
   0x2   :  { %16 = vsyncpa [#allocation9], 0 }
   0x3   :  { %17 = vsyncpa [#allocation4], 0 }
   0x4   :  { %22 = vsyncadd [#allocation3], 96  ;;  %s834_s30 = smov [#allocation5]   ;;  %s694_s13 = scalar_lea.hbm %s1033_s1, 128 }
   0x5   :  { %s35_s10 = sshll.u32 %s834_s30, 4  ;;  %p695_p0 = scmp.ne.s32.totalorder %s1033_s1, %s694_s13  ;;  %s36_s10 = int_to_ptr.vmem [resolvable:$true] %s35_s10 }
   0x6   :  { %p698_p1 = scmp.lt.u32.totalorder %s694_s13, %s1033_s1 }
   0x8   :  { %p700_p2 = pnand %p698_p1, %p695_p0 }
   0xa   :  { %703 = shalt.err (!%p700_p2)
}
   0xb   :  { %s704_s18 = scalar_lea.vmem %s36_s10, 128  ;;  %p709_p4 = scmp.lt.s32.totalorder %s36_s10, %s36_s10 }
   0xc   :  { %p705_p3 = scmp.ne.s32.totalorder %s36_s10, %s704_s18  ;;  %p710_p5 = scmp.lt.s32.totalorder %s704_s18, %s704_s18 }
   0xe   :  { %p711_p6 = por %p710_p5, %p709_p4 }
  0x10   :  { %p712_p7 = pnand %p711_p6, %p705_p3 }
  0x12   :  { %715 = shalt.err (!%p712_p7)
}
  0x13   :  { %s835_s19 = smov 64   ;;  %s836_s20 = smov 4  }
  0x14   :  { %41 = dma.hbm_to_vmem [thread:$0]  %s1033_s1, 128, %s36_s10, [#allocation6], %s835_s19, %s835_s19, %s836_s20  }
  0x15   :  { %s837_s23 = smov [#allocation8]   ;;  %s838_s25 = smov [#allocation2]  }
  0x16   :  { %s63_s24 = sshll.u32 %s837_s23, 4  ;;  %s23_s26 = sshll.u32 %s838_s25, 4  ;;  %s64_s24 = int_to_ptr.vmem [resolvable:$true] %s63_s24  ;;  %s24_s26 = int_to_ptr.vmem [resolvable:$true] %s23_s26 }
  0x17   :  { %s716_s29 = scalar_lea.hbm %s1037_s5, 1024 }
  0x18   :  { %p717_p8 = scmp.ne.s32.totalorder %s1037_s5, %s716_s29  ;;  %p720_p9 = scmp.lt.u32.totalorder %s716_s29, %s1037_s5 }
  0x1a   :  { %p722_p10 = pnand %p720_p9, %p717_p8 }
  0x1c   :  { %725 = shalt.err (!%p722_p10)
}
  0x1d   :  { %s726_s1 = scalar_lea.vmem %s64_s24, 1024  ;;  %p731_p12 = scmp.lt.s32.totalorder %s64_s24, %s64_s24 }
  0x1e   :  { %p727_p11 = scmp.ne.s32.totalorder %s64_s24, %s726_s1  ;;  %p732_p13 = scmp.lt.s32.totalorder %s726_s1, %s726_s1 }
  0x20   :  { %p733_p0 = por %p732_p13, %p731_p12 }
  0x22   :  { %p734_p1 = pnand %p733_p0, %p727_p11 }
  0x24   :  { %737 = shalt.err (!%p734_p1)
}
  0x25   :  { %69 = dma.hbm_to_vmem [thread:$0]  %s1037_s5, 1024, %s64_s24, [#allocation9], %s835_s19, %s835_s19, %s836_s20  }
  0x26   :  { %s738_s17 = scalar_lea.hbm %s1032_s0, 32 }
  0x27   :  { %p739_p2 = scmp.ne.s32.totalorder %s1032_s0, %s738_s17  ;;  %p742_p3 = scmp.lt.u32.totalorder %s738_s17, %s1032_s0 }
  0x29   :  { %p744_p4 = pnand %p742_p3, %p739_p2 }
  0x2b   :  { %747 = shalt.err (!%p744_p4)
}
  0x2c   :  { %s748_s25 = scalar_lea.vmem %s24_s26, 32  ;;  %s752_s27 = scalar_lea.vmem %s24_s26, 128 }
  0x2d   :  { %p749_p5 = scmp.ne.s32.totalorder %s24_s26, %s748_s25  ;;  %p753_p6 = scmp.lt.s32.totalorder %s24_s26, %s24_s26 }
  0x2e   :  { %p754_p7 = scmp.lt.s32.totalorder %s752_s27, %s748_s25 }
  0x30   :  { %p755_p8 = por %p754_p7, %p753_p6 }
  0x32   :  { %p756_p9 = pnand %p755_p8, %p749_p5 }
  0x34   :  { %759 = shalt.err (!%p756_p9)
}
  0x35   :  { %s839_s5 = smov 32   ;;  %s840_s24 = smov 2  }
  0x36   :  { %29 = dma.hbm_to_vmem [thread:$0]  %s1032_s0, 32, %s24_s26, [#allocation3], %s839_s5, %s839_s5, %s840_s24  }
  0x37   :  { %s841_s30 = smov [#allocation7]   ;;  %s842_s12 = smov [#allocation10]  }
  0x38   :  { %s49_s11 = sshll.u32 %s841_s30, 4  ;;  %s77_s13 = sshll.u32 %s842_s12, 4  ;;  %s50_s11 = int_to_ptr.vmem [resolvable:$true] %s49_s11  ;;  %s78_s13 = int_to_ptr.vmem [resolvable:$true] %s77_s13 }
  0x39   :  { %s760_s14 = scalar_lea.hbm %s1035_s3, 1024 }
  0x3a   :  { %p761_p10 = scmp.ne.s32.totalorder %s1035_s3, %s760_s14  ;;  %p764_p11 = scmp.lt.u32.totalorder %s760_s14, %s1035_s3 }
  0x3c   :  { %p766_p12 = pnand %p764_p11, %p761_p10 }
  0x3e   :  { %769 = shalt.err (!%p766_p12)
}
  0x3f   :  { %s770_s0 = scalar_lea.vmem %s50_s11, 1024  ;;  %p775_p0 = scmp.lt.s32.totalorder %s50_s11, %s50_s11 }
  0x40   :  { %p771_p13 = scmp.ne.s32.totalorder %s50_s11, %s770_s0  ;;  %p776_p1 = scmp.lt.s32.totalorder %s770_s0, %s770_s0 }
  0x42   :  { %p777_p2 = por %p776_p1, %p775_p0 }
  0x44   :  { %p778_p3 = pnand %p777_p2, %p771_p13 }
  0x46   :  { %781 = shalt.err (!%p778_p3)
}
  0x47   :  { %55 = dma.hbm_to_vmem [thread:$0]  %s1035_s3, 1024, %s50_s11, [#allocation6], %s835_s19, %s835_s19, %s836_s20  }
  0x48   :  { %s782_s25 = scalar_lea.hbm %s1039_s7, 1024 }
  0x49   :  { %p783_p4 = scmp.ne.s32.totalorder %s1039_s7, %s782_s25  ;;  %p786_p5 = scmp.lt.u32.totalorder %s782_s25, %s1039_s7 }
  0x4b   :  { %p788_p6 = pnand %p786_p5, %p783_p4 }
  0x4d   :  { %791 = shalt.err (!%p788_p6)
}
  0x4e   :  { %s792_s12 = scalar_lea.vmem %s78_s13, 1024  ;;  %p797_p8 = scmp.lt.s32.totalorder %s78_s13, %s78_s13 }
  0x4f   :  { %p793_p7 = scmp.ne.s32.totalorder %s78_s13, %s792_s12  ;;  %p798_p9 = scmp.lt.s32.totalorder %s792_s12, %s792_s12 }
  0x51   :  { %p799_p10 = por %p798_p9, %p797_p8 }
  0x53   :  { %p800_p11 = pnand %p799_p10, %p793_p7 }
  0x55   :  { %803 = shalt.err (!%p800_p11)
}
  0x56   :  { %83 = dma.hbm_to_vmem [thread:$0]  %s1039_s7, 1024, %s78_s13, [#allocation9], %s835_s19, %s835_s19, %s836_s20  }
  0x57   :  { %826 = dma.done.wait [#allocation3], 128  }
  0x58   :  { %827 = vsyncadd [#allocation3], 4294967168 }
  0x59   :  { %828 = dma.done.wait [#allocation6], 1152  }
  0x5a   :  { %829 = vsyncadd [#allocation6], 4294966144 }
  0x5b   :  { %830 = dma.done.wait [#allocation9], 2048  }
  0x5c   :  { %831 = vsyncadd [#allocation9], 4294965248  ;;  %vm122_vm0 = vcmask 1045504   ;;  %v843_v0 = vmov 0.0   ;;  %vm844_vm1 = vmmov 0   ;;  %vm123_vm2 = vcmask 1046528  }
  0x5d   :  { %588 = vmatprep.subr.bf16.mxu0 %v843_v0  ;;  %594 = vmatprep.subr.bf16.mxu1 %v843_v0  ;;  %v845_v1 = vmov 65535   ;;  %v667_v4 = vld [vmem:[#allocation5] sm:$0x7f]   ;;  %v102_v5 = vld [vmem:[#allocation2] sm:$0xff]  ;;  %v668_v7 = vld [vmem:[#allocation7] sm:$0xff]   ;;  %vm118_vm3 = vcmask 105472  }
  0x5e   :  { %590 = vmatprep.mubr.msk.bf16.mxu0 %vm844_vm1, %v843_v0  ;;  %610 = vmatprep.mubr.msk.bf16.mxu1 %vm844_vm1, %v843_v0  ;;  %v124_v2 = vsel %vm122_vm0, 4294967295, %v845_v1  ;;  %v103_v8 = vpack.c.bf16 %v102_v5, %v102_v5  ;;  %v669_v9 = vld [vmem:[#allocation7 + $0x8] sm:$0xff]   ;;  %v670_v10 = vld [vmem:[#allocation7 + $0x10] sm:$0xff]   ;;  %v671_v11 = vld [vmem:[#allocation7 + $0x18] sm:$0xff]  }
  0x5f   :  { %v125_v3 = vsel %vm123_vm2, %v124_v2, 0  ;;  %595 = vmatpush3.bf16.msra.mxu1 %v668_v7  ;;  %v672_v12 = vld [vmem:[#allocation7 + $0x20] sm:$0xff]   ;;  %v673_v13 = vld [vmem:[#allocation7 + $0x28] sm:$0xff]   ;;  %v674_v14 = vld [vmem:[#allocation7 + $0x30] sm:$0xff]  }
  0x60   :  { %v127_v6 = vand.u32 %v667_v4, %v125_v3  ;;  %596 = vmatprep.subr.bf16.mxu1 %v843_v0  ;;  %v675_v15 = vld [vmem:[#allocation7 + $0x38] sm:$0xff]   ;;  %v676_v16 = vld [vmem:[#allocation8] sm:$0xff]   ;;  %v677_v17 = vld [vmem:[#allocation8 + $0x8] sm:$0xff]  }
  0x61   :  { %v678_v18 = vld [vmem:[#allocation8 + $0x10] sm:$0xff]   ;;  %v679_v19 = vld [vmem:[#allocation8 + $0x18] sm:$0xff]   ;;  %v680_v20 = vld [vmem:[#allocation8 + $0x20] sm:$0xff]  }
  0x62   :  { %589 = vmatpush3.bf16.msra.mxu0 %v127_v6  ;;  %v681_v21 = vld [vmem:[#allocation8 + $0x28] sm:$0xff]   ;;  %v529_v22 = vld [vmem:[%s1034_s2] ss:$0 sm:$0xff]  ;;  %v683_v31 = vld [vmem:[#allocation8 + $0x38] sm:$0xff]  }
  0x63   :  { %614 = vmatprep.subr.bf16.mxu0 %v843_v0  ;;  %597 = vmatpush3.bf16.msra.mxu1 %v669_v9  ;;  %v682_v30 = vld [vmem:[#allocation8 + $0x30] sm:$0xff]   ;;  %v684_v32 = vld [vmem:[#allocation10] sm:$0xff]   ;;  %v685_v33 = vld [vmem:[#allocation10 + $0x8] sm:$0xff]  }
  0x64   :  { %598 = vmatprep.subr.bf16.mxu1 %v843_v0  ;;  %v686_v34 = vld [vmem:[#allocation10 + $0x10] sm:$0xff]   ;;  %v687_v35 = vld [vmem:[#allocation10 + $0x18] sm:$0xff]   ;;  %v688_v36 = vld [vmem:[#allocation10 + $0x20] sm:$0xff]  }
  0x65   :  { %591 = vmatmul.mubr.msk.bf16.vlgmr.msra.gmra.mrb[0].mxu0 %vm118_vm3, %v103_v8  ;;  %v689_v37 = vld [vmem:[#allocation10 + $0x28] sm:$0xff]   ;;  %v532_v38 = vld [vmem:[%s1036_s4] ss:$0 sm:$0xff]  ;;  %v691_v47 = vld [vmem:[#allocation10 + $0x38] sm:$0xff]  }
  0x66   :  { %630 = vmatprep.mubr.msk.bf16.mxu0 %vm844_vm1, %v843_v0  ;;  %615 = vmatpush3.bf16.msra.mxu0 %v676_v16  ;;  %v690_v46 = vld [vmem:[#allocation10 + $0x30] sm:$0xff]  }
  0x67   :  { %599 = vmatpush3.bf16.msra.mxu1 %v670_v10  ;;  %616 = vmatprep.subr.bf16.mxu0 %v843_v0  ;;  %v541_v48 = vld [vmem:[%s1038_s6] ss:$0 sm:$0xff] }
  0x68   :  { %600 = vmatprep.subr.bf16.mxu1 %v843_v0  ;;  %v550_v56 = vld [vmem:[%s1040_s8] ss:$0 sm:$0xff] }
  0x6a   :  { %617 = vmatpush3.bf16.msra.mxu0 %v677_v17 }
  0x6b   :  { %601 = vmatpush3.bf16.msra.mxu1 %v671_v11  ;;  %618 = vmatprep.subr.bf16.mxu0 %v843_v0 }
  0x6c   :  { %602 = vmatprep.subr.bf16.mxu1 %v843_v0 }
  0x6e   :  { %619 = vmatpush3.bf16.msra.mxu0 %v678_v18 }
  0x6f   :  { %603 = vmatpush3.bf16.msra.mxu1 %v672_v12  ;;  %620 = vmatprep.subr.bf16.mxu0 %v843_v0 }
  0x70   :  { %604 = vmatprep.subr.bf16.mxu1 %v843_v0 }
  0x72   :  { %621 = vmatpush3.bf16.msra.mxu0 %v679_v19 }
  0x73   :  { %605 = vmatpush3.bf16.msra.mxu1 %v673_v13  ;;  %622 = vmatprep.subr.bf16.mxu0 %v843_v0 }
  0x74   :  { %606 = vmatprep.subr.bf16.mxu1 %v843_v0 }
  0x76   :  { %623 = vmatpush3.bf16.msra.mxu0 %v680_v20 }
  0x77   :  { %607 = vmatpush3.bf16.msra.mxu1 %v674_v14  ;;  %624 = vmatprep.subr.bf16.mxu0 %v843_v0 }
  0x78   :  { %608 = vmatprep.subr.bf16.mxu1 %v843_v0 }
  0x7a   :  { %625 = vmatpush3.bf16.msra.mxu0 %v681_v21 }
  0x7b   :  { %609 = vmatpush3.bf16.msra.mxu1 %v675_v15  ;;  %626 = vmatprep.subr.bf16.mxu0 %v843_v0 }
  0x7c   :  { %634 = vmatprep.subr.bf16.mxu1 %v843_v0 }
  0x7e   :  { %627 = vmatpush3.bf16.msra.mxu0 %v682_v30 }
  0x7f   :  { %628 = vmatprep.subr.bf16.mxu0 %v843_v0 }
  0x82   :  { %629 = vmatpush3.bf16.msra.mxu0 %v683_v31 }
 0x138   :  { %v163_v23 = vpop.f32.mrb[0].mxu0 }
 0x139   :  { %v164_v24 = vadd.f32 %v529_v22, %v163_v23  ;;  %v592_v25 = vpop.f32.mrb[1].mxu0 }
 0x13a   :  { %v166_v26 = vpop.f32.mrb[2].mxu0 }
 0x13b   :  { %v169_v27 = vmax.f32 %v164_v24, 0.0  ;;  %v593_v28 = vpop.f32.mrb[3].mxu0 }
 0x13d   :  { %v170_v29 = vpack.c.bf16 %v169_v27, %v169_v27 }
 0x13f   :  { %611 = vmatmul.mubr.bf16.vlgmr.msra.gmra.mrb[0].mxu1 %v170_v29 }
 0x140   :  { %650 = vmatprep.mubr.msk.bf16.mxu1 %vm844_vm1, %v843_v0  ;;  %635 = vmatpush3.bf16.msra.mxu1 %v684_v32 }
 0x141   :  { %636 = vmatprep.subr.bf16.mxu1 %v843_v0 }
 0x144   :  { %637 = vmatpush3.bf16.msra.mxu1 %v685_v33 }
 0x145   :  { %638 = vmatprep.subr.bf16.mxu1 %v843_v0 }
 0x148   :  { %639 = vmatpush3.bf16.msra.mxu1 %v686_v34 }
 0x149   :  { %640 = vmatprep.subr.bf16.mxu1 %v843_v0 }
 0x14c   :  { %641 = vmatpush3.bf16.msra.mxu1 %v687_v35 }
 0x14d   :  { %642 = vmatprep.subr.bf16.mxu1 %v843_v0 }
 0x150   :  { %643 = vmatpush3.bf16.msra.mxu1 %v688_v36 }
 0x151   :  { %644 = vmatprep.subr.bf16.mxu1 %v843_v0 }
 0x154   :  { %645 = vmatpush3.bf16.msra.mxu1 %v689_v37 }
 0x155   :  { %646 = vmatprep.subr.bf16.mxu1 %v843_v0 }
 0x158   :  { %647 = vmatpush3.bf16.msra.mxu1 %v690_v46 }
 0x159   :  { %648 = vmatprep.subr.bf16.mxu1 %v843_v0 }
 0x15c   :  { %649 = vmatpush3.bf16.msra.mxu1 %v691_v47 }
 0x212   :  { %v276_v39 = vpop.f32.mrb[0].mxu1 }
 0x213   :  { %v277_v40 = vadd.f32 %v532_v38, %v276_v39  ;;  %v612_v41 = vpop.f32.mrb[1].mxu1 }
 0x214   :  { %v279_v42 = vpop.f32.mrb[2].mxu1 }
 0x215   :  { %v282_v43 = vmax.f32 %v277_v40, 0.0  ;;  %v613_v44 = vpop.f32.mrb[3].mxu1 }
 0x217   :  { %v283_v45 = vpack.c.bf16 %v282_v43, %v282_v43 }
 0x219   :  { %631 = vmatmul.mubr.bf16.vlgmr.msra.gmra.mrb[4].mxu0 %v283_v45 }
 0x2ec   :  { %v389_v49 = vpop.f32.mrb[4].mxu0 }
 0x2ed   :  { %v390_v50 = vadd.f32 %v541_v48, %v389_v49  ;;  %v632_v51 = vpop.f32.mrb[5].mxu0 }
 0x2ee   :  { %v392_v52 = vpop.f32.mrb[6].mxu0 }
 0x2ef   :  { %v395_v53 = vmax.f32 %v390_v50, 0.0  ;;  %v633_v54 = vpop.f32.mrb[7].mxu0 }
 0x2f1   :  { %v396_v55 = vpack.c.bf16 %v395_v53, %v395_v53 }
 0x2f3   :  { %651 = vmatmul.mubr.bf16.vlgmr.msra.gmra.mrb[4].mxu1 %v396_v55 }
 0x3c6   :  { %v502_v57 = vpop.f32.mrb[4].mxu1 }
 0x3c7   :  { %v503_v58 = vadd.f32 %v550_v56, %v502_v57  ;;  %v652_v59 = vpop.f32.mrb[5].mxu1 }
 0x3c8   :  { %v505_v60 = vpop.f32.mrb[6].mxu1 }
 0x3c9   :  { %692 = vtanh.f32 %v503_v58  ;;  %v653_v61 = vpop.f32.mrb[7].mxu1 }
 0x3d3   :  { %v693_v62 = vpop.eup %692 }
 0x3d4   :  { %509 = vst [vmem:[#allocation11] sm:$0xff] %v693_v62 }
 0x3d5   :  { %514 = vsyncadd [#allocation4], 96  ;;  %s846_s6 = smov [#allocation11]  }
 0x3d6   :  { %s515_s14 = sshll.u32 %s846_s6, 4  ;;  %s516_s14 = int_to_ptr.vmem [resolvable:$true] %s515_s14 }
 0x3d7   :  { %s804_s15 = scalar_lea.vmem %s516_s14, 32  ;;  %s808_s16 = scalar_lea.vmem %s516_s14, 128 }
 0x3d8   :  { %p805_p12 = scmp.ne.s32.totalorder %s516_s14, %s804_s15  ;;  %p809_p13 = scmp.lt.s32.totalorder %s516_s14, %s516_s14 }
 0x3d9   :  { %p810_p0 = scmp.lt.s32.totalorder %s808_s16, %s804_s15 }
 0x3db   :  { %p811_p1 = por %p810_p0, %p809_p13 }
 0x3dd   :  { %p812_p2 = pnand %p811_p1, %p805_p12 }
 0x3df   :  { %815 = shalt.err (!%p812_p2)
}
 0x3e0   :  { %s816_s18 = scalar_lea.hbm %s1041_s9, 32 }
 0x3e1   :  { %p817_p3 = scmp.ne.s32.totalorder %s1041_s9, %s816_s18  ;;  %p820_p4 = scmp.lt.u32.totalorder %s816_s18, %s1041_s9 }
 0x3e3   :  { %p822_p5 = pnand %p820_p4, %p817_p3 }
 0x3e5   :  { %825 = shalt.err (!%p822_p5)
}
 0x3e6   :  { %521 = dma.vmem_to_hbm [thread:$0]  %s516_s14, 32, %s1041_s9, [#allocation4], %s839_s5, %s839_s5, %s840_s24  }
 0x3e7   :  { %832 = dma.done.wait [#allocation4], 128  }
 0x3e8   :  { %833 = vsyncadd [#allocation4], 4294967168 }
 0x3e9   :  { %525 = vsyncpa [#allocation3], 1 }
 0x3ea   :  { %526 = vsyncpa [#allocation6], 1 }
 0x3eb   :  { %527 = vsyncpa [#allocation9], 1 }
 0x3ec   :  { %528 = vsyncpa [#allocation4], 1 }

</bundles_post_ra>
